<compile_context>
chip_gen: v6e
topology: v6e:2x2x1
jax: 0.10.0
libtpu: 0.0.40
codegen_flags: <defaults>
</compile_context>

<pallas_src>
import functools

import jax
import jax.numpy as jnp
import numpy as np
from jax.experimental import pallas as pl
from jax.experimental.pallas import tpu as pltpu


# ---------------------------------------------------------------------------
# Shared conv tile: shift-and-matmul on a flattened, halo-padded input window,
# with all kh*kw taps folded into the contraction dimension (single bf16 MXU dot).
# ---------------------------------------------------------------------------
def _conv_tile(x_ref, w_ref, *, kh, kw, wpp, m):
    # x_ref: (1, 1, Cin, win) bf16, win = m + (kh-1)*wpp + (kw-1)
    # w_ref: (Cout, kh*kw*Cin) bf16
    # returns (Cout, m) f32  (m = th*wpp wide pixels; columns >= ow per row are garbage)
    xw = x_ref[0, 0]                                            # (Cin, win) bf16
    taps = [xw[:, i * wpp + j: i * wpp + j + m]
            for i in range(kh) for j in range(kw)]              # each (Cin, m)
    xk = taps[0] if len(taps) == 1 else jnp.concatenate(taps, axis=0)  # (kh*kw*Cin, m)
    return jnp.dot(w_ref[...], xk, preferred_element_type=jnp.float32)


# ---------------------------------------------------------------------------
# Pass 1: per-(image, row-tile) BN partial statistics (sum, centered sum-of-squares)
# ---------------------------------------------------------------------------
def _stats_kernel(x_ref, w_ref, mask_ref, st_ref, *, kh, kw, wpp, m, inv_count):
    acc = _conv_tile(x_ref, w_ref, kh=kh, kw=kw, wpp=wpp, m=m)  # (Cout, m) f32
    mask = mask_ref[...]                                        # (1, m) f32
    accv = acc * mask
    s1 = jnp.sum(accv, axis=1, keepdims=True)                   # (Cout, 1)
    mu = s1 * inv_count                                         # tile mean
    d = (acc - mu) * mask
    ssd = jnp.sum(d * d, axis=1, keepdims=True)                 # centered sum of squares
    st_ref[0, 0] = jnp.concatenate([s1, ssd], axis=1)           # (Cout, 2)


# ---------------------------------------------------------------------------
# Pass 2: recompute conv tile, apply BN affine + ReLU, write lane-dense output
# ---------------------------------------------------------------------------
def _conv_bn_relu_kernel(x_ref, w_ref, ss_ref, o_ref, *, kh, kw, wpp, m, th, ow):
    acc = _conv_tile(x_ref, w_ref, kh=kh, kw=kw, wpp=wpp, m=m)  # (Cout, m) f32
    if ow == wpp:
        dense = acc                                             # already dense
    else:
        # wide -> dense compaction (drop the kw-1 garbage columns of each row);
        # pure in-register relayout that hides under the output DMA.
        dense = jnp.concatenate(
            [acc[:, q * wpp: q * wpp + ow] for q in range(th)], axis=1)  # (Cout, th*ow)
    scale = ss_ref[:, 0:1]                                      # (Cout, 1)
    shift = ss_ref[:, 1:2]
    o_ref[0] = jnp.maximum(dense * scale + shift, 0.0)


def _choose_row_tile(oh, ow, wp, target_lanes=1024):
    """Row tile th: divides oh, keeps the dense output block lane dim a multiple of
    128 (or the full image), and lands near `target_lanes` wide lanes per tile."""
    best, best_score = oh, None
    for t in range(1, oh + 1):
        if oh % t:
            continue
        if t != oh and (t * ow) % 128 != 0:
            continue
        score = abs(t * wp - target_lanes)
        if best_score is None or score < best_score:
            best, best_score = t, score
    return best


# ---------------------------------------------------------------------------
# ConvBlock forward
# ---------------------------------------------------------------------------
def conv_block_forward(x, weight, bias, gamma, beta, *,
                       stride=1, padding=1, eps=1e-5, row_tile=None):
    if stride != 1:
        # TODO(synk): stride>1 needs strided tap slices in the wide layout; not implemented.
        raise NotImplementedError("conv_block_forward currently supports stride=1 only")
    del bias  # Train-mode BN subtracts the batch mean -> a constant per-channel bias cancels.

    n, cin, h, w = x.shape
    cout, wcin, kh, kw = weight.shape
    assert wcin == cin  # TODO(synk): grouped / dilated Conv2d not supported.

    hp, wp = h + 2 * padding, w + 2 * padding
    oh, ow = hp - kh + 1, wp - kw + 1

    th = row_tile if row_tile is not None else _choose_row_tile(oh, ow, wp)
    if oh % th or (th != oh and (th * ow) % 128):
        raise ValueError(f"row_tile={th} incompatible with oh={oh}, ow={ow}")
    nrt = oh // th
    m = th * wp                                  # wide pixels per row tile
    halo = (kh - 1) * wp + (kw - 1)
    win = m + halo                               # flattened input window per tile

    # Zero-pad spatially; extra bottom rows so the last tile's window stays in bounds.
    need = oh * wp + halo
    extra = max(0, -(-(need - hp * wp) // wp))
    x_pad = jnp.pad(x, ((0, 0), (0, 0), (padding, padding + extra), (padding, padding)))
    x_flat = x_pad.reshape(n, cin, (hp + extra) * wp).astype(jnp.bfloat16)

    # Per-(image, row-tile) overlapping windows: halo duplicated so every in-kernel
    # tap offset is static and the BlockSpecs stay plain Blocked (no dynamic slicing).
    # TODO(synk): for very large images, switch to manual halo DMA to avoid the
    # (kh-1)/th duplication and the wrapper gather pass.
    idx = (jnp.arange(nrt) * m)[:, None] + jnp.arange(win)[None, :]
    x_win = jnp.moveaxis(x_flat[:, :, idx], 2, 1)          # (n, nrt, cin, win) bf16

    kcin = kh * kw * cin
    w2 = jnp.transpose(weight, (0, 2, 3, 1)).reshape(cout, kcin).astype(jnp.bfloat16)

    # Valid ("kept") wide columns inside a tile: lane % wp < ow.
    colmask = ((jnp.arange(m, dtype=jnp.int32) % wp) < ow)
    colmask = colmask.astype(jnp.float32).reshape(1, m)

    count = th * ow                                         # valid pixels per tile

    def vmem_limit(block_bytes, scratch_bytes):
        est = 2 * block_bytes + scratch_bytes + (4 << 20)   # double-buffered blocks + headroom
        return int(min(64 << 20, max(32 << 20, est)))

    scratch = kcin * m * 2 + cout * m * 4                   # stacked-K operand + f32 acc

    # ---- pass 1: BN partial statistics ------------------------------------
    stats = pl.pallas_call(
        functools.partial(_stats_kernel, kh=kh, kw=kw, wpp=wp, m=m,
                          inv_count=1.0 / count),
        out_shape=jax.ShapeDtypeStruct((n, nrt, cout, 2), jnp.float32),
        grid=(n, nrt),
        in_specs=[
            pl.BlockSpec((1, 1, cin, win), lambda i, r: (i, r, 0, 0)),
            pl.BlockSpec((cout, kcin), lambda i, r: (0, 0)),
            pl.BlockSpec((1, m), lambda i, r: (0, 0)),
        ],
        out_specs=pl.BlockSpec((1, 1, cout, 2), lambda i, r: (i, r, 0, 0)),
        compiler_params=pltpu.CompilerParams(
            dimension_semantics=("parallel", "parallel"),
            vmem_limit_bytes=vmem_limit(
                cin * win * 2 + cout * kcin * 2 + m * 4 + cout * 8, scratch)),
    )(x_win, w2, colmask)

    # ---- tiny (N*nrt, Cout) stats combine -> per-channel affine (f32) ------
    s1 = stats[..., 0]                                       # (n, nrt, cout)
    ssd = stats[..., 1]
    total = n * nrt * count                                  # == n * oh * ow
    mean = jnp.sum(s1, axis=(0, 1)) / total                  # (cout,)
    mu_t = s1 / count
    var = (jnp.sum(ssd, axis=(0, 1))
           + count * jnp.sum((mu_t - mean) ** 2, axis=(0, 1))) / total
    var = jnp.maximum(var, 0.0)                              # biased var (PyTorch train mode)
    inv = jax.lax.rsqrt(var + eps)
    scale = gamma * inv
    shift = beta - mean * scale
    ss = jnp.stack([scale, shift], axis=1).astype(jnp.float32)   # (Cout, 2)

    # ---- pass 2: recompute conv, affine + ReLU, lane-dense NCHW write ------
    out_flat = pl.pallas_call(
        functools.partial(_conv_bn_relu_kernel, kh=kh, kw=kw, wpp=wp, m=m,
                          th=th, ow=ow),
        out_shape=jax.ShapeDtypeStruct((n, cout, oh * ow), jnp.float32),
        grid=(n, nrt),
        in_specs=[
            pl.BlockSpec((1, 1, cin, win), lambda i, r: (i, r, 0, 0)),
            pl.BlockSpec((cout, kcin), lambda i, r: (0, 0)),
            pl.BlockSpec((cout, 2), lambda i, r: (0, 0)),
        ],
        out_specs=pl.BlockSpec((1, cout, th * ow), lambda i, r: (i, 0, r)),
        compiler_params=pltpu.CompilerParams(
            dimension_semantics=("parallel", "parallel"),
            vmem_limit_bytes=vmem_limit(
                cin * win * 2 + cout * kcin * 2 + cout * 8 + cout * th * ow * 4,
                scratch + cout * th * ow * 4)),
    )(x_win, w2, ss)

    return out_flat.reshape(n, cout, oh, ow)                 # free NCHW view


# ---------------------------------------------------------------------------
# Pure-JAX reference (matches PyTorch ConvBlock in train mode, bias included)
# ---------------------------------------------------------------------------
def conv_block_reference(x, weight, bias, gamma, beta, *, stride=1, padding=1, eps=1e-5):
    y = jax.lax.conv_general_dilated(
        x, weight,
        window_strides=(stride, stride),
        padding=[(padding, padding), (padding, padding)],
        dimension_numbers=("NCHW", "OIHW", "NCHW"),
    ) + bias.reshape(1, -1, 1, 1)
    mean = jnp.mean(y, axis=(0, 2, 3), keepdims=True)
    var = jnp.mean((y - mean) ** 2, axis=(0, 2, 3), keepdims=True)
    yn = (y - mean) * jax.lax.rsqrt(var + eps)
    yn = yn * gamma.reshape(1, -1, 1, 1) + beta.reshape(1, -1, 1, 1)
    return jnp.maximum(yn, 0.0)


if __name__ == "__main__":
    # ConvBlock(in_channels=4, out_channels=8, kernel_size=3, stride=1, padding=1)
    N, CIN, H, W = 2, 4, 16, 16
    COUT, KH, KW = 8, 3, 3
    STRIDE, PAD = 1, 1

    key = jax.random.PRNGKey(0)
    kx, kw_, kb, kg, kbe = jax.random.split(key, 5)

    x = jax.random.normal(kx, (N, CIN, H, W), dtype=jnp.float32)
    fan_in = CIN * KH * KW
    weight = jax.random.normal(kw_, (COUT, CIN, KH, KW), dtype=jnp.float32) / np.sqrt(fan_in)
    bias = jax.random.normal(kb, (COUT,), dtype=jnp.float32) * 0.1
    gamma = 1.0 + 0.1 * jax.random.normal(kg, (COUT,), dtype=jnp.float32)
    beta = 0.1 * jax.random.normal(kbe, (COUT,), dtype=jnp.float32)

    ref = conv_block_reference(x, weight, bias, gamma, beta, stride=STRIDE, padding=PAD)

    # Tolerance sized for bf16 MXU operands with f32 accumulation.
    out = jax.block_until_ready(
        conv_block_forward(x, weight, bias, gamma, beta, stride=STRIDE, padding=PAD))
    np.testing.assert_allclose(np.asarray(out), np.asarray(ref), rtol=2e-2, atol=2e-2)

    # Also exercise the multi-row-tile path (nrt > 1, 128-lane dense output blocks).
    out2 = jax.block_until_ready(
        conv_block_forward(x, weight, bias, gamma, beta, stride=STRIDE, padding=PAD,
                           row_tile=8))
    np.testing.assert_allclose(np.asarray(out2), np.asarray(ref), rtol=2e-2, atol=2e-2)

    print("KERNEL_OK")
</pallas_src>

<mosaic_0001>
module attributes {stable_mosaic.version = 11 : i64} {
  func.func @_stats_kernel(%arg0: i32, %arg1: i32, %arg2: memref<1x1x4x326xbf16, #tpu.memory_space<vmem>>, %arg3: memref<8x36xbf16, #tpu.memory_space<vmem>>, %arg4: memref<1x288xf32, #tpu.memory_space<vmem>>, %arg5: memref<1x1x8x2xf32, #tpu.memory_space<vmem>>) attributes {dimension_semantics = [#tpu.dimension_semantics<parallel>, #tpu.dimension_semantics<parallel>], iteration_bounds = array<i64: 2, 1>, scalar_prefetch = 0 : i64, scratch_operands = 0 : i64, tpu.core_type = #tpu.core_type<tc>, window_params = [{transform_indices = @transform_0, window_bounds = array<i64: 1, 1, 4, 326>}, {pipeline_mode = #tpu.pipeline_mode<synchronous>, transform_indices = @transform_1, window_bounds = array<i64: 8, 36>}, {pipeline_mode = #tpu.pipeline_mode<synchronous>, transform_indices = @transform_2, window_bounds = array<i64: 1, 288>}, {transform_indices = @transform_3, window_bounds = array<i64: 1, 1, 8, 2>}]} {
    %c0 = arith.constant 0 : index
    %c0_0 = arith.constant 0 : index
    %c0_1 = arith.constant 0 : index
    %c0_2 = arith.constant 0 : index
    %0 = vector.load %arg2[%c0, %c0_0, %c0_1, %c0_2] : memref<1x1x4x326xbf16, #tpu.memory_space<vmem>>, vector<1x1x4x326xbf16>
    %1 = vector.shape_cast %0 : vector<1x1x4x326xbf16> to vector<4x326xbf16>
    %2 = vector.extract_strided_slice %1 {offsets = [0, 0], sizes = [4, 288], strides = [1, 1]} : vector<4x326xbf16> to vector<4x288xbf16>
    %3 = vector.extract_strided_slice %1 {offsets = [0, 1], sizes = [4, 288], strides = [1, 1]} : vector<4x326xbf16> to vector<4x288xbf16>
    %4 = vector.extract_strided_slice %1 {offsets = [0, 2], sizes = [4, 288], strides = [1, 1]} : vector<4x326xbf16> to vector<4x288xbf16>
    %5 = vector.extract_strided_slice %1 {offsets = [0, 18], sizes = [4, 288], strides = [1, 1]} : vector<4x326xbf16> to vector<4x288xbf16>
    %6 = vector.extract_strided_slice %1 {offsets = [0, 19], sizes = [4, 288], strides = [1, 1]} : vector<4x326xbf16> to vector<4x288xbf16>
    %7 = vector.extract_strided_slice %1 {offsets = [0, 20], sizes = [4, 288], strides = [1, 1]} : vector<4x326xbf16> to vector<4x288xbf16>
    %8 = vector.extract_strided_slice %1 {offsets = [0, 36], sizes = [4, 288], strides = [1, 1]} : vector<4x326xbf16> to vector<4x288xbf16>
    %9 = vector.extract_strided_slice %1 {offsets = [0, 37], sizes = [4, 288], strides = [1, 1]} : vector<4x326xbf16> to vector<4x288xbf16>
    %10 = vector.extract_strided_slice %1 {offsets = [0, 38], sizes = [4, 288], strides = [1, 1]} : vector<4x326xbf16> to vector<4x288xbf16>
    %11 = tpu.concatenate %2, %3, %4, %5, %6, %7, %8, %9, %10 in 0 : vector<4x288xbf16>, vector<4x288xbf16>, vector<4x288xbf16>, vector<4x288xbf16>, vector<4x288xbf16>, vector<4x288xbf16>, vector<4x288xbf16>, vector<4x288xbf16>, vector<4x288xbf16> -> vector<36x288xbf16>
    %c0_3 = arith.constant 0 : index
    %c0_4 = arith.constant 0 : index
    %12 = vector.load %arg3[%c0_3, %c0_4] : memref<8x36xbf16, #tpu.memory_space<vmem>>, vector<8x36xbf16>
    %cst = arith.constant dense<0.000000e+00> : vector<8x288xf32>
    %13 = tpu.matmul %12, %11, %cst {dimension_numbers = #tpu.dot_dimension_numbers<[1], [0], [0], [1], [0, 0, 1, 1], [], []>} : vector<8x36xbf16>, vector<36x288xbf16>, vector<8x288xf32> -> vector<8x288xf32>
    %c0_5 = arith.constant 0 : index
    %c0_6 = arith.constant 0 : index
    %14 = vector.load %arg4[%c0_5, %c0_6] : memref<1x288xf32, #tpu.memory_space<vmem>>, vector<1x288xf32>
    %15 = vector.broadcast %14 : vector<1x288xf32> to vector<8x288xf32>
    %16 = arith.mulf %13, %15 : vector<8x288xf32>
    %cst_7 = arith.constant dense<0.000000e+00> : vector<8xf32>
    %17 = vector.multi_reduction <add>, %16, %cst_7 [1] : vector<8x288xf32> to vector<8xf32>
    %18 = vector.shape_cast %17 : vector<8xf32> to vector<8x1xf32>
    %cst_8 = arith.constant 3.906250e-03 : f32
    %19 = vector.broadcast %cst_8 : f32 to vector<8x1xf32>
    %20 = arith.mulf %18, %19 : vector<8x1xf32>
    %21 = vector.broadcast %20 : vector<8x1xf32> to vector<8x288xf32>
    %22 = arith.subf %13, %21 : vector<8x288xf32>
    %23 = vector.broadcast %14 : vector<1x288xf32> to vector<8x288xf32>
    %24 = arith.mulf %22, %23 : vector<8x288xf32>
    %25 = arith.mulf %24, %24 : vector<8x288xf32>
    %cst_9 = arith.constant dense<0.000000e+00> : vector<8xf32>
    %26 = vector.multi_reduction <add>, %25, %cst_9 [1] : vector<8x288xf32> to vector<8xf32>
    %27 = vector.shape_cast %26 : vector<8xf32> to vector<8x1xf32>
    %28 = tpu.concatenate %18, %27 in 1 : vector<8x1xf32>, vector<8x1xf32> -> vector<8x2xf32>
    %c0_10 = arith.constant 0 : index
    %c0_11 = arith.constant 0 : index
    %c0_12 = arith.constant 0 : index
    %c0_13 = arith.constant 0 : index
    %29 = vector.load %arg5[%c0_10, %c0_11, %c0_12, %c0_13] : memref<1x1x8x2xf32, #tpu.memory_space<vmem>>, vector<1x1x8x2xf32>
    %30 = vector.shape_cast %29 : vector<1x1x8x2xf32> to vector<8x2xf32>
    %31 = vector.shape_cast %28 : vector<8x2xf32> to vector<1x1x8x2xf32>
    tpu.vector_store %arg5[%c0_10, %c0_11, %c0_12, %c0_13], %31 {strides = array<i32>} : memref<1x1x8x2xf32, #tpu.memory_space<vmem>>, vector<1x1x8x2xf32>,
    return
  }
  func.func @transform_0(%arg0: i32, %arg1: i32) -> (i32, i32, i32, i32) {
    %c0_i32 = arith.constant 0 : i32
    %c0_i32_0 = arith.constant 0 : i32
    %c0_i32_1 = arith.constant 0 : i32
    return %arg0, %arg1, %c0_i32, %c0_i32_0 : i32, i32, i32, i32
  }
  func.func @transform_1(%arg0: i32, %arg1: i32) -> (i32, i32) {
    %c0_i32 = arith.constant 0 : i32
    %c0_i32_0 = arith.constant 0 : i32
    %c0_i32_1 = arith.constant 0 : i32
    return %c0_i32, %c0_i32_0 : i32, i32
  }
  func.func @transform_2(%arg0: i32, %arg1: i32) -> (i32, i32) {
    %c0_i32 = arith.constant 0 : i32
    %c0_i32_0 = arith.constant 0 : i32
    %c0_i32_1 = arith.constant 0 : i32
    return %c0_i32, %c0_i32_0 : i32, i32
  }
  func.func @transform_3(%arg0: i32, %arg1: i32) -> (i32, i32, i32, i32) {
    %c0_i32 = arith.constant 0 : i32
    %c0_i32_0 = arith.constant 0 : i32
    %c0_i32_1 = arith.constant 0 : i32
    return %arg0, %arg1, %c0_i32, %c0_i32_0 : i32, i32, i32, i32
  }
}

</mosaic_0001>

<bundles_post_ra>
// kernel: tpu_custom_call.1
= control target key start
LH: loop header
LB: loop body
LE: loop exit
PB: predicated region body
PF: predicated region fallthrough
CT: control target
= control target key end

     0   :  { %8 = vsyncpa [#allocation3], 0  ;;  %s1059_s0 = inlined_call_operand.hbm [shape: bf16[2,1,4,326], index: 0, kind: input, shape index: {}]   ;;  %s1060_s1 = inlined_call_operand.hbm [shape: bf16[8,36], index: 1, kind: input, shape index: {}]   ;;  %s1061_s2 = inlined_call_operand.vmem [shape: f32[1,288], index: 2, kind: input, shape index: {}]   ;;  %s1062_s3 = inlined_call_operand.vmem [shape: f32[2,1,8,2], index: 3, kind: output, shape index: {}]  }
   0x1   :  { %10 = vsyncpa [#allocation3 + $0x1], 0 }
   0x2   :  { %11 = vsyncpa [#allocation5], 0  ;;  %s869_s12 = smov 0   ;;  %s871_s13 = smov 0  }
   0x3   :  { %s873_s14 = smov 0   ;;  %s875_s15 = smov 0  }
   0x4   :  { %s877_s16 = smov 0   ;;  %s879_s17 = smov 0  }
   0x5 LB: > { %s614_s18 = sadd.s32 4294967295, %s833_s17   ;;  %p51_p0 = scmp.ne.s32.totalorder %s817_s13, %s813_s12  ;;  %s833_s17 = sphi %s879_s17, %s17_s17   ;;  %s829_s16 = sphi %s877_s16, %s1072_s16   ;;  %s825_s15 = sphi %s875_s15, %s1071_s15   ;;  %s821_s14 = sphi %s873_s14, %s1070_s14   ;;  %s817_s13 = sphi %s871_s13, %s1069_s13   ;;  %s813_s12 = sphi %s869_s12, %s1068_s12  }
   0x6   : > { %p899_p1 = scmp.eq.s32.totalorder %s614_s18, 0  ;;  %p616_p2 = scmp.ge.s32.totalorder %s833_s17, 1 }
   0x7   : > { %p132_p3 = scmp.lt.s32.totalorder %s833_s17, 3  ;;  %s835_s22 = smov [#allocation4]  }
   0x8   : > { %p907_p4 = por %p899_p1, %p51_p0  ;;  %s145_s23 = sshll.u32 %s835_s22, 4  ;;  %s146_s23 = int_to_ptr.vmem [resolvable:$true] %s145_s23 }
   0x9   : > { %p911_p5 = pnand %p616_p2, %p132_p3  ;;  %s29_s25 = sadd.s32 1, %s829_s16 }
   0xa   : > { %s38_s26 = sadd.s32 1, %s821_s14  ;;  %p31_p8 = scmp.ge.s32.totalorder %s29_s25, 2 }
   0xb   : > { %p651_p6 = pneg %p911_p5  ;;  %s736_s27 = scalar_lea.vmem %s146_s23, 64 }
   0xc   : > { %p737_p10 = scmp.ne.s32.totalorder %s146_s23, %s736_s27  ;;  %p744_p13 = scmp.lt.s32.totalorder %s146_s23, %s146_s23 }
   0xd   : > { %p919_p7 = pnand %p651_p6, %p899_p1  ;;  %p745_p0 = scmp.lt.s32.totalorder %s736_s27, %s736_s27 }
   0xf   : > { %p727_p9 = pneg %p919_p7  ;;  %p746_p2 = por %p745_p0, %p744_p13 }
  0x11   : > { %p739_p11 = pnand %p737_p10, %p727_p9 }
  0x13   : > { %p740_p12 = pneg %p739_p11 }
  0x15   : > { %p747_p3 = pnand %p746_p2, %p740_p12 }
  0x17   : > { %750 = shalt.err (!%p747_p3)
}
  0x18   : > { %654 = dma.hbm_to_vmem [thread:$0]  (!%p919_p7), %s1060_s1, 64, %s146_s23, [#allocation5]  }
  0x19   : > { %s1074_s25 = smov (%p31_p8, %s29_s25), 0  ;;  %p45_p6 = scmp.ne.s32.totalorder %s821_s14, %s817_s13 }
  0x1a   : > { %p46_p9 = scmp.eq.s32.totalorder %s833_s17, 0  ;;  %s33_s30 = ssub.s32 %s829_s16, %s1074_s25 }
  0x1b   : > { %p660_p10 = scmp.lt.s32.totalorder %s833_s17, 2  ;;  %p36_p11 = scmp.eq.s32.totalorder %s33_s30, 0 }
  0x1c   : > { %p47_p12 = por %p46_p9, %p45_p6  ;;  %s159_s4 = sand.u32 1, %s821_s14  }
  0x1d   : > { %s643_s5 = smul.u32 96, %s829_s16  ;;  %s160_s22 = scalar_lea.sflag [#allocation3], %s159_s4 }
  0x1e   : > { %s943_s6 = scalar_select %p36_p11, %s821_s14, %s38_s26  }
  0x1f   : > { %s642_s7 = smul.u32 6, %s159_s4  ;;  %p945_p13 = pnand %p660_p10, %p47_p12 }
  0x20   : > { %s171_s11 = scalar_lea.hbm %s1059_s0, %s643_s5  ;;  %s836_s24 = smov [#allocation2]  }
  0x21   : > { %s163_s12 = scalar_lea.vmem [#allocation2], %s642_s7  ;;  %p753_p7 = pneg %p945_p13 }
  0x22   : > { %s173_s18 = sshll.u32 %s163_s12, 4  ;;  %s769_s26 = sshll.u32 %s836_s24, 4  ;;  %s174_s18 = int_to_ptr.vmem [resolvable:$true] %s173_s18  ;;  %s770_s26 = int_to_ptr.vmem [resolvable:$false] %s769_s26 }
  0x23   : > { %s764_s23 = scalar_lea.vmem %s174_s18, 96  ;;  %s771_s27 = scalar_lea.vmem %s770_s26, 192 }
  0x24   : > { %p765_p8 = scmp.ne.s32.totalorder %s174_s18, %s764_s23  ;;  %p772_p3 = scmp.lt.s32.totalorder %s174_s18, %s770_s26 }
  0x25   : > { %p773_p6 = scmp.lt.s32.totalorder %s771_s27, %s764_s23 }
  0x26   : > { %p767_p0 = pnand %p765_p8, %p753_p7 }
  0x27   : > { %p774_p9 = por %p773_p6, %p772_p3 }
  0x28   : > { %p768_p2 = pneg %p767_p0 }
  0x2a   : > { %p775_p10 = pnand %p774_p9, %p768_p2 }
  0x2c   : > { %778 = shalt.err (!%p775_p10)
}
  0x2d   : > { %658 = dma.hbm_to_vmem [thread:$0]  (!%p945_p13), %s171_s11, 96, %s174_s18, %s160_s22  }
  0x2e   : > { %182 = sbr.rel (%p911_p5) target bundleno = 719 (0x2cf), region = 32  ;;  %s184_s28 = sand.u32 (!%p911_p5), 1, %s817_s13  }
  0x2f   : > { %s644_s29 = smul.u32 (!%p911_p5), 6, %s184_s28  ;;  %s185_s30 = scalar_lea.sflag (!%p911_p5), [#allocation3], %s184_s28 }
  0x31   : > { %s188_s4 = scalar_lea.vmem (!%p911_p5), [#allocation2], %s644_s29 }
  0x33   : > { %804 = dma.done.wait (%p907_p4), %s185_s30, 96  }
  0x34   : > { %806 = vsyncadd (%p907_p4), %s185_s30, 4294967200 }
  0x35   : > { %808 = dma.done.wait (%p899_p1), [#allocation5], 64  }
  0x36   : > { %810 = vsyncadd (%p899_p1), [#allocation5], 4294967232  ;;  %v231_v0 = vlaneseq  ;;  %v837_v1 = vmov 1983009808   ;;  %v838_v4 = vmov 0.0   ;;  %s839_s20 = smov 109  }
  0x37   : > { %v229_v2 = vunpack.c.l.s4 %v837_v1  ;;  %632 = vmatprep.subr.bf16.mxu1 %v838_v4  ;;  %v225_v7 = vld [vmem:[%s188_s4] sm:$0x3f]  ;;  %s840_s19 = smov 90   ;;  %s841_s21 = smov 108   ;;  %vm845_vm0 = vmmov 0   ;;  %v847_v18 = vmov 0  }
  0x38   : > { %v967_v3 = vshrl.u32 %v231_v0, 7  ;;  %v227_v9 = vcombine.high %v225_v7, %v225_v7  ;;  %v243_v11 = vcombine.low %v225_v7, %v225_v7  ;;  %s842_s5 = smov 92   ;;  %s843_s7 = smov 91   ;;  %638 = vmatprep.mubr.msk.bf16.mxu1 %vm845_vm0, %v838_v4  ;;  %424 = vmatprep.mubr.bf16.mxu0 %v847_v18  ;;  %vm327_vm1 = vcmask 1041408   ;;  %v473_v18 = vld [vmem:[%s1061_s2] sm:$0x7] }
  0x39   : > { %v230_v5 = vunpack.c.0.s8 %v229_v2  ;;  %s844_s8 = smov 127   ;;  %s846_s9 = smov 126   ;;  %vm324_vm2 = vcmask 736256   ;;  %vm297_vm3 = vcmask 883712   ;;  %vm306_vm4 = vcmask 752640  }
  0x3a   : > { %s848_s10 = smov 110   ;;  %vm288_vm5 = vcmask 891904   ;;  %vm337_vm6 = vcmask 1043456   ;;  %vm315_vm7 = vcmask 744448   ;;  %vm344_vm8 = vcmask 1045504   ;;  %p217_p1 = scmp.lt.s32.totalorder %s825_s15, 1 }
  0x3b   : > { %v233_v6 = vsub.s32 %v230_v5, %v967_v3  ;;  %vm258_vm9 = vcmask 1039360   ;;  %vm269_vm10 = vcmask 1031168   ;;  %vm279_vm11 = vcmask 900096  }
  0x3c   : > { %vm379_vm12 = vcmask 293888   ;;  %vm494_vm13 = vcmask 261120   ;;  %s1076_s15 = smov (!%p217_p1, %s825_s15), 1  ;;  %vm514_vm14 = vcmask 7168   ;;  %vm516_vm15 = vcmask 15360  }
  0x3d   : > { %v971_v8 = vrot.slane %v225_v7, %v233_v6  ;;  %v975_v10 = vrot.slane %v227_v9, %v233_v6  ;;  %v250_v13 = vrot.slane %v243_v11, %v233_v6  ;;  %s622_s18 = sshll.u32 %s1076_s15, 3 }
  0x3e   : > { %s223_s24 = scalar_lea.vmem %s1062_s3, %s622_s18 }
  0x3f   : > { %282 = vrot.lane.b32.xlu1 %v971_v8, %s839_s20  ;;  %318 = vrot.lane.b32.xlu0 %v971_v8, %s840_s19  ;;  %v981_v12 = vcombine.high %v971_v8, %v971_v8  ;;  %v251_v14 = vcombine.high %v250_v13, %v250_v13  ;;  %v261_v15 = vcombine.low %v971_v8, %v971_v8 }
  0x40   : > { %v262_v16 = vcombine.low %v975_v10, %v975_v10  ;;  %v272_v17 = vcombine.low %v250_v13, %v250_v13 }
  0x43   : > { %295 = vrot.lane.b32.xlu0 %v971_v8, %s841_s21  ;;  %322 = vrot.lane.b32.xlu1 %v975_v10, %s840_s19 }
  0x47   : > { %320 = vrot.lane.b32.xlu0 %v981_v12, %s840_s19  ;;  %284 = vrot.lane.b32.xlu1 %v981_v12, %s839_s20 }
  0x4b   : > { %286 = vrot.lane.b32.xlu0 %v975_v10, %s839_s20  ;;  %293 = vrot.lane.b32.xlu1 %v251_v14, %s841_s21 }
  0x4f   : > { %291 = vrot.lane.b32.xlu0 %v250_v13, %s841_s21  ;;  %302 = vrot.lane.b32.xlu1 %v971_v8, %s842_s5 }
  0x53   : > { %300 = vrot.lane.b32.xlu1 %v261_v15, %s842_s5  ;;  %304 = vrot.lane.b32.xlu0 %v262_v16, %s842_s5 }
  0x57   : > { %313 = vrot.lane.b32.xlu1 %v261_v15, %s843_s7  ;;  %311 = vrot.lane.b32.xlu0 %v250_v13, %s843_s7 }
  0x5b   : > { %254 = vrot.lane.b32.xlu1 %v251_v14, %s844_s8  ;;  %309 = vrot.lane.b32.xlu0 %v272_v17, %s843_s7 }
  0x5f   : > { %252 = vrot.lane.b32.xlu1 %v250_v13, %s844_s8  ;;  %256 = vrot.lane.b32.xlu0 %v971_v8, %s844_s8 }
  0x63   : > { %267 = vrot.lane.b32.xlu1 %v262_v16, %s846_s9  ;;  %265 = vrot.lane.b32.xlu0 %v971_v8, %s846_s9 }
  0x67   : > { %275 = vrot.lane.b32.xlu1 %v250_v13, %s848_s10  ;;  %263 = vrot.lane.b32.xlu0 %v261_v15, %s846_s9 }
  0x6b   : > { %273 = vrot.lane.b32.xlu1 %v272_v17, %s848_s10  ;;  %277 = vrot.lane.b32.xlu0 %v261_v15, %s848_s10  ;;  %v378_v17 = vld [vmem:[#allocation4] sm:$0xf] }
  0xb1   : > { %v283_v19 = vpop.permute.xlu1 %282  ;;  %v319_v20 = vpop.permute.xlu0 %318 }
  0xb5   : > { %v296_v21 = vpop.permute.xlu0 %295  ;;  %v323_v22 = vpop.permute.xlu1 %322 }
  0xb6   : > { %v390_v23 = vsel %vm327_vm1, %v323_v22, 0 }
  0xb7   : > { %633 = vmatpush3.bf16.msra.mxu1 %v390_v23 }
  0xb8   : > { %634 = vmatprep.subr.bf16.mxu1 %v838_v4 }
  0xb9   : > { %v321_v24 = vpop.permute.xlu0 %320  ;;  %v285_v25 = vpop.permute.xlu1 %284 }
  0xba   : > { %v326_v26 = vsel %vm324_vm2, %v321_v24, %v323_v22  ;;  %v325_v27 = vsel %vm324_vm2, %v319_v20, %v321_v24  ;;  %v289_v49 = vsel %vm288_vm5, %v283_v19, %v285_v25  ;;  %v477_v19 = vsub.s32 0, %v967_v3 }
  0xbb   : > { %623 = vmatprep.subr.msk.bf16.mxu0 %vm327_vm1, %v326_v26  ;;  %v384_v28 = vsel %vm327_vm1, %v325_v27, 0  ;;  %v481_v20 = vsub.s32 1, %v967_v3 }
  0xbc   : > { %403 = vmatpush1.bf16.msra.mxu0 %v384_v28  ;;  %v478_v23 = vrot.slane %v473_v18, %v477_v19 }
  0xbd   : > { %v287_v29 = vpop.permute.xlu0 %286  ;;  %v294_v30 = vpop.permute.xlu1 %293  ;;  %v482_v24 = vrot.slane %v473_v18, %v481_v20 }
  0xbe   : > { %v290_v35 = vsel %vm288_vm5, %v285_v25, %v287_v29  ;;  %v299_v36 = vsel %vm297_vm3, %v294_v30, %v296_v21  ;;  %v362_v38 = vsel %vm327_vm1, %v287_v29, %v296_v21 }
  0xbf   : > { %v359_v39 = vsel %vm327_vm1, %v290_v35, %v299_v36 }
  0xc1   : > { %v292_v31 = vpop.permute.xlu0 %291  ;;  %v303_v32 = vpop.permute.xlu1 %302 }
  0xc2   : > { %v298_v43 = vsel %vm297_vm3, %v292_v31, %v294_v30 }
  0xc3   : > { %v356_v50 = vsel %vm327_vm1, %v289_v49, %v298_v43 }
  0xc5   : > { %v301_v33 = vpop.permute.xlu1 %300  ;;  %v305_v34 = vpop.permute.xlu0 %304 }
  0xc6   : > { %v308_v37 = vsel %vm306_vm4, %v303_v32, %v305_v34  ;;  %v368_v40 = vsel %vm337_vm6, %v362_v38, %v305_v34  ;;  %v307_v47 = vsel %vm306_vm4, %v301_v33, %v303_v32 }
  0xc7   : > { %v366_v46 = vsel %vm337_vm6, %v359_v39, %v308_v37  ;;  %v364_v54 = vsel %vm337_vm6, %v356_v50, %v307_v47 }
  0xc9   : > { %v314_v41 = vpop.permute.xlu1 %313  ;;  %v312_v42 = vpop.permute.xlu0 %311 }
  0xca   : > { %v317_v44 = vsel %vm315_vm7, %v312_v42, %v314_v41  ;;  %v376_v45 = vsel %vm344_vm8, %v368_v40, %v314_v41 }
  0xcb   : > { %635 = vmatpush3.bf16.msra.mxu1 %v376_v45  ;;  %v373_v48 = vsel %vm344_vm8, %v366_v46, %v317_v44 }
  0xcc   : > { %404 = vmatprep.subr.bf16.mxu0 %v373_v48  ;;  %636 = vmatprep.subr.bf16.mxu1 %v838_v4 }
  0xcd   : > { %v255_v51 = vpop.permute.xlu1 %254  ;;  %v310_v52 = vpop.permute.xlu0 %309 }
  0xce   : > { %v316_v53 = vsel %vm315_vm7, %v310_v52, %v312_v42 }
  0xcf   : > { %v370_v55 = vsel %vm344_vm8, %v364_v54, %v316_v53 }
  0xd0   : > { %405 = vmatpush1.bf16.msra.mxu0 %v370_v55 }
  0xd1   : > { %v253_v56 = vpop.permute.xlu1 %252  ;;  %v257_v57 = vpop.permute.xlu0 %256 }
  0xd2   : > { %v260_v60 = vsel %vm258_vm9, %v255_v51, %v257_v57  ;;  %v259_v63 = vsel %vm258_vm9, %v253_v56, %v255_v51  ;;  %v336_v4 = vsel %vm327_vm1, %v975_v10, %v257_v57 }
  0xd3   : > { %v333_v2 = vsel %vm327_vm1, %v981_v12, %v260_v60  ;;  %v330_v5 = vsel %vm327_vm1, %v971_v8, %v259_v63  ;;  %v485_v8 = vsub.s32 2, %v967_v3 }
  0xd5   : > { %v268_v58 = vpop.permute.xlu1 %267  ;;  %v266_v59 = vpop.permute.xlu0 %265  ;;  %v486_v21 = vrot.slane %v473_v18, %v485_v8 }
  0xd6   : > { %v271_v0 = vsel %vm269_vm10, %v266_v59, %v268_v58  ;;  %v343_v6 = vsel %vm337_vm6, %v336_v4, %v268_v58 }
  0xd7   : > { %v341_v11 = vsel %vm337_vm6, %v333_v2, %v271_v0 }
  0xd9   : > { %v276_v61 = vpop.permute.xlu1 %275  ;;  %v264_v62 = vpop.permute.xlu0 %263 }
  0xda   : > { %v270_v1 = vsel %vm269_vm10, %v264_v62, %v266_v59 }
  0xdb   : > { %v339_v16 = vsel %vm337_vm6, %v330_v5, %v270_v1 }
  0xdd   : > { %v274_v7 = vpop.permute.xlu1 %273  ;;  %v278_v9 = vpop.permute.xlu0 %277 }
  0xde   : > { %v280_v13 = vsel %vm279_vm11, %v274_v7, %v276_v61  ;;  %v281_v14 = vsel %vm279_vm11, %v276_v61, %v278_v9  ;;  %v352_v15 = vsel %vm344_vm8, %v343_v6, %v278_v9 }
  0xdf   : > { %637 = vmatpush3.bf16.msra.mxu1 %v352_v15  ;;  %v349_v12 = vsel %vm344_vm8, %v341_v11, %v281_v14  ;;  %v346_v10 = vsel %vm344_vm8, %v339_v16, %v280_v13 }
  0xe0   : > { %406 = vmatprep.subr.bf16.mxu0 %v349_v12 }
  0xe1   : > { %407 = vmatpush1.bf16.msra.mxu0 %v346_v10 }
  0xe2   : > { %639 = vmatmul.mubr.msk.bf16.vlgmr.msra.gmra.mxu1 %vm379_vm12, %v378_v17 }
  0xe4   : > { %624 = vmatmul.mubr.msk.bf16.vlgmr.msra.gmra.mxu0 %vm379_vm12, %v378_v17 }
 0x1a2   : > { %v467_v22 = vpop.f32.mrf.mxu1 }
 0x1a3   : > { %v492_v25 = vmul.f32 %v486_v21, %v467_v22 }
 0x1a4   : > { %v426_v26 = vpop.f32.mrf.mxu0  ;;  %v640_v27 = vpop.f32.mrf.mxu1 }
 0x1a5   : > { %v490_v30 = vmul.f32 %v478_v23, %v426_v26  ;;  %v495_v34 = vsel %vm494_vm13, %v492_v25, 0.0 }
 0x1a6   : > { %v428_v28 = vpop.f32.mrf.mxu0  ;;  %v470_v29 = vpop.f32.mrf.mxu1 }
 0x1a7   : > { %v491_v31 = vmul.f32 %v482_v24, %v428_v28 }
 0x1a8   : > { %v430_v32 = vpop.f32.mrf.mxu0  ;;  %v641_v33 = vpop.f32.mrf.mxu1 }
 0x1a9   : > { %v493_v35 = vadd.f32 %v491_v31, %v490_v30 }
 0x1aa   : > { %v431_v36 = vpop.f32.mrf.mxu0 }
 0x1ab   : > { %v496_v37 = vadd.f32 %v495_v34, %v493_v35 }
 0x1ad   : > { %497 = vadd.xlane.f32.xlu0 %v496_v37 }
 0x236   : > { %v498_v3 = vpop.xlane.xlu0 %497 }
 0x237   : > { %v499_v38 = vmul.f32 0.00390625, %v498_v3 }
 0x239   : > { %v500_v39 = vsub.f32 %v426_v26, %v499_v38  ;;  %v501_v40 = vsub.f32 %v428_v28, %v499_v38  ;;  %v502_v41 = vsub.f32 %v467_v22, %v499_v38 }
 0x23b   : > { %v503_v42 = vmul.f32 %v500_v39, %v478_v23  ;;  %v504_v43 = vmul.f32 %v501_v40, %v482_v24  ;;  %v505_v44 = vmul.f32 %v502_v41, %v486_v21 }
 0x23d   : > { %v506_v45 = vmul.f32 %v503_v42, %v503_v42  ;;  %v507_v46 = vmul.f32 %v504_v43, %v504_v43  ;;  %v508_v47 = vmul.f32 %v505_v44, %v505_v44 }
 0x23f   : > { %v509_v48 = vadd.f32 %v507_v46, %v506_v45  ;;  %v510_v49 = vsel %vm494_vm13, %v508_v47, 0.0 }
 0x241   : > { %v511_v50 = vadd.f32 %v510_v49, %v509_v48 }
 0x243   : > { %512 = vadd.xlane.f32.xlu1 %v511_v50 }
 0x2cc   : > { %v513_v51 = vpop.xlane.xlu1 %512 }
 0x2cd   : > { %v515_v52 = vsel %vm514_vm14, %v498_v3, %v513_v51 }
 0x2ce   : > { %517 = vst.msk [vmem:[%s223_s24] sm:$0xff] %vm516_vm15, %v515_v52 }
 0x2cf PF: > { %s17_s17 = sadd.s32 1, %s833_s17   ;;  %s1068_s12 = smov %s817_s13 }
 0x2d0   : > { %p14_p4 = scmp.ge.s32.totalorder %s17_s17, 4   ;;  %s1069_s13 = smov %s821_s14 }
 0x2d1   : > { %s1070_s14 = smov %s943_s6  ;;  %s1071_s15 = smov %s829_s16 }
 0x2d2   : > { %s1072_s16 = smov %s1074_s25  ;;  %16 = sbr.rel (!%p14_p4) target bundleno = 5 (0x5), region = 76 }
 0x2d7   :  { %543 = vsyncpa [#allocation3], 1 }
 0x2d8   :  { %545 = vsyncpa [#allocation3 + $0x1], 1 }
 0x2d9   :  { %546 = vsyncpa [#allocation5], 1 }

</bundles_post_ra>
